<compile_context>
chip_gen: v7x
topology: tpu7x:2x2x1
jax: 0.10.0
libtpu: 0.0.40
codegen_flags: <defaults>
</compile_context>

<pallas_src>
import functools

import jax
import jax.numpy as jnp
import numpy as np
from jax.experimental import pallas as pl
from jax.experimental.pallas import tpu as pltpu


# ----------------------------------------------------------------------------
# Pallas kernel: K-tap valid 1D cross-correlation, taps are trace-time floats
# ----------------------------------------------------------------------------
def _conv1d_deriv_kernel(x_ref, o_ref, *, taps, lout):
    """x_ref: VMEM (TM, Lin) f32; o_ref: VMEM (TM, Lout) f32.

    out[r, i] = sum_k taps[k] * x[r, i + k]   (PyTorch Conv1d cross-correlation,
    padding=0, bias=False, filter already scaled by 1/deno).
    Fully unrolled at trace time -> at most K immediate-scalar FMAs on the VPU.
    """
    acc = None
    for k, w in enumerate(taps):
        if w == 0.0:                      # drop zero taps at trace time
            continue
        term = x_ref[:, pl.ds(k, lout)]
        if w != 1.0:
            term = w * term
        acc = term if acc is None else acc + term
    if acc is None:                       # degenerate all-zero filter
        acc = jnp.zeros((x_ref.shape[0], lout), jnp.float32)
    o_ref[...] = acc.astype(o_ref.dtype)


# ----------------------------------------------------------------------------
# Wrapper: accepts (N, C=1, L) like the torch module, returns (N, 1, L-K+1)
# ----------------------------------------------------------------------------
def conv1d_derivative(x_ncl, taps_scaled, *, row_tile=512):
    n, c, lin = x_ncl.shape
    ksize = len(taps_scaled)
    lout = lin - ksize + 1
    rows = n * c

    x2d = x_ncl.reshape(rows, lin).astype(jnp.float32)

    if rows <= row_tile:
        # Single block covering the full row extent: block_shape equals the
        # array dims, so no (8,128) padding / wrapper copy is needed.
        tm = rows
        rows_p = rows
    else:
        tm = row_tile                     # multiple of 8 (sublane aligned)
        rows_p = pl.cdiv(rows, tm) * tm
        if rows_p != rows:
            x2d = jnp.pad(x2d, ((0, rows_p - rows), (0, 0)))

    out2d = pl.pallas_call(
        functools.partial(_conv1d_deriv_kernel, taps=taps_scaled, lout=lout),
        out_shape=jax.ShapeDtypeStruct((rows_p, lout), jnp.float32),
        grid=(rows_p // tm,),
        in_specs=[
            # activations: full sequence on the lane axis, row-tiled sublanes
            pl.BlockSpec((tm, lin), lambda i: (i, 0)),
        ],
        out_specs=pl.BlockSpec((tm, lout), lambda i: (i, 0)),
        compiler_params=pltpu.CompilerParams(
            dimension_semantics=("parallel",)),
    )(x2d)

    return out2d[:rows].reshape(n, c, lout)


class Conv1dDerivative:
    """Mirrors the PyTorch module's constructor/forward semantics."""

    def __init__(self, DerFilter, deno, kernel_size=3, name=''):
        self.deno = float(deno)
        self.name = name
        self.input_channels = 1
        self.output_channels = 1
        self.kernel_size = kernel_size
        w = np.asarray(DerFilter, dtype=np.float32).reshape(-1)
        assert w.shape[0] == kernel_size, (w.shape, kernel_size)
        # conv(x, W) / deno == conv(x, W / deno): fold the constant divide into
        # the fixed, non-trainable filter and bake the taps as compile-time
        # constants (the filter never trains, so this is exact).
        self._taps = tuple(float(v) / self.deno for v in w)

    def __call__(self, x):
        return conv1d_derivative(x, self._taps)


# Pure-JAX reference (same math, no Pallas) for verification.
def conv1d_derivative_ref(x, DerFilter, deno):
    w = jnp.asarray(DerFilter, jnp.float32).reshape(-1)
    k = int(w.shape[0])
    lout = x.shape[-1] - k + 1
    y = sum(w[i] * x[..., i:i + lout] for i in range(k))
    return y / jnp.float32(deno)


if __name__ == "__main__":
    key = jax.random.PRNGKey(0)

    # Module implies input (batch, 1, L); pick small shapes with Lout = 128
    # so the output's lane axis is dense and unmasked.
    batch, chans, length = 2, 1, 130
    x = jax.random.normal(key, (batch, chans, length), jnp.float32)

    dt = 0.05
    der_filter = [[[-1.0, 0.0, 1.0]]]     # central-difference d/dt stencil
    deno = 2.0 * dt

    mod = Conv1dDerivative(DerFilter=der_filter, deno=deno, kernel_size=3,
                           name="partial_t")
    fwd = jax.jit(lambda inp: mod(inp))

    out = jax.block_until_ready(fwd(x))
    assert out.shape == (batch, chans, length - 2), out.shape

    ref = jax.block_until_ready(conv1d_derivative_ref(x, der_filter, deno))
    np.testing.assert_allclose(np.asarray(out), np.asarray(ref),
                               rtol=1e-5, atol=1e-5)
    print("KERNEL_OK")
</pallas_src>

<mosaic_0001>
module attributes {stable_mosaic.version = 11 : i64} {
  func.func @_conv1d_deriv_kernel(%arg0: i32, %arg1: memref<2x130xf32, #tpu.memory_space<vmem>>, %arg2: memref<2x128xf32, #tpu.memory_space<vmem>>) attributes {dimension_semantics = [#tpu.dimension_semantics<parallel>], iteration_bounds = array<i64: 1>, scalar_prefetch = 0 : i64, scratch_operands = 0 : i64, tpu.core_type = #tpu.core_type<tc>, window_params = [{transform_indices = @transform_0, window_bounds = array<i64: 2, 130>}, {transform_indices = @transform_1, window_bounds = array<i64: 2, 128>}]} {
    %c0 = arith.constant 0 : index
    %c0_0 = arith.constant 0 : index
    %0 = vector.load %arg1[%c0, %c0_0] : memref<2x130xf32, #tpu.memory_space<vmem>>, vector<2x128xf32>
    %cst = arith.constant -1.000000e+01 : f32
    %1 = vector.broadcast %cst : f32 to vector<2x128xf32>
    %2 = arith.mulf %1, %0 : vector<2x128xf32>
    %c0_1 = arith.constant 0 : index
    %c2 = arith.constant 2 : index
    %3 = vector.load %arg1[%c0_1, %c2] : memref<2x130xf32, #tpu.memory_space<vmem>>, vector<2x128xf32>
    %cst_2 = arith.constant 1.000000e+01 : f32
    %4 = vector.broadcast %cst_2 : f32 to vector<2x128xf32>
    %5 = arith.mulf %4, %3 : vector<2x128xf32>
    %6 = arith.addf %2, %5 : vector<2x128xf32>
    %c0_3 = arith.constant 0 : index
    %c0_4 = arith.constant 0 : index
    %7 = vector.load %arg2[%c0_3, %c0_4] : memref<2x128xf32, #tpu.memory_space<vmem>>, vector<2x128xf32>
    tpu.vector_store %arg2[%c0_3, %c0_4], %6 {strides = array<i32>} : memref<2x128xf32, #tpu.memory_space<vmem>>, vector<2x128xf32>,
    return
  }
  func.func @transform_0(%arg0: i32) -> (i32, i32) {
    %c0_i32 = arith.constant 0 : i32
    %c0_i32_0 = arith.constant 0 : i32
    return %arg0, %c0_i32 : i32, i32
  }
  func.func @transform_1(%arg0: i32) -> (i32, i32) {
    %c0_i32 = arith.constant 0 : i32
    %c0_i32_0 = arith.constant 0 : i32
    return %arg0, %c0_i32 : i32, i32
  }
}

</mosaic_0001>

<bundles_post_ra>
// kernel: _lambda_.1
= control target key start
LH: loop header
LB: loop body
LE: loop exit
PB: predicated region body
PF: predicated region fallthrough
CT: control target
= control target key end

     0   :  { %s92_s0 = inlined_call_operand.vmem [shape: f32[2,130], index: 0, kind: input, shape index: {}]   ;;  %s93_s1 = inlined_call_operand.hbm [shape: f32[2,128], index: 1, kind: output, shape index: {}]  }
   0x1   :  { %v11_v0 = vld [vmem:[%s92_s0] sm:$0xf] }
   0x2   :  { %6 = vsyncpa [#allocation3], 0  ;;  %v12_v1 = vmul.f32 10.0, %v11_v0  ;;  %s62_s8 = smov 126   ;;  %v9_v2 = vld [vmem:[%s92_s0] sm:$0x3] }
   0x3   :  { %vm17_vm0 = vcmask 1031168   ;;  %v10_v4 = vmul.f32 -10.0, %v9_v2  ;;  %s63_s11 = smov [#allocation2]  }
   0x4   :  { %14 = vrot.lane.b32.xlu0 %v12_v1, %s62_s8  ;;  %s28_s12 = sshll.u32 %s63_s11, 4  ;;  %s29_s12 = int_to_ptr.vmem [resolvable:$true] %s28_s12 }
   0x5   :  { %s38_s13 = scalar_lea.vmem %s29_s12, 32  ;;  %p43_p1 = scmp.lt.s32.totalorder %s29_s12, %s29_s12 }
   0x6   :  { %p39_p0 = scmp.ne.s32.totalorder %s29_s12, %s38_s13  ;;  %p44_p2 = scmp.lt.s32.totalorder %s38_s13, %s38_s13 }
   0x8   :  { %p45_p3 = por %p44_p2, %p43_p1 }
   0xa   :  { %p46_p4 = pnand %p45_p3, %p39_p0 }
  0x76   :  { %v15_v3 = vpop.permute.xlu0 %14 }
  0x77   :  { %v16_v5 = vrot.slane %v15_v3, 2 }
  0x79   :  { %v18_v6 = vsel %vm17_vm0, %v15_v3, %v16_v5 }
  0x7a   :  { %v20_v7 = vadd.f32 %v18_v6, %v10_v4 }
  0x7c   :  { %21 = vst [vmem:[#allocation2] sm:$0x3] %v20_v7 }
  0x7d   :  { %49 = shalt.err (!%p46_p4)
}
  0x7e   :  { %s50_s0 = scalar_lea.hbm %s93_s1, 32 }
  0x7f   :  { %p51_p5 = scmp.ne.s32.totalorder %s93_s1, %s50_s0  ;;  %p54_p6 = scmp.lt.u32.totalorder %s50_s0, %s93_s1 }
  0x81   :  { %p56_p7 = pnand %p54_p6, %p51_p5 }
  0x83   :  { %59 = shalt.err (!%p56_p7)
}
  0x84   :  { %31 = dma.vmem_to_hbm [thread:$0]  %s29_s12, 32, %s93_s1, [#allocation3]  }
  0x85   :  { %60 = dma.done.wait [#allocation3], 32  }
  0x86   :  { %61 = vsyncadd [#allocation3], 4294967264 }
  0x87   :  { %35 = vsyncpa [#allocation3], 1 }

</bundles_post_ra>
